<compile_context>
chip_gen: v7x
topology: tpu7x:2x2x1
jax: 0.10.0
libtpu: 0.0.40
codegen_flags: <defaults>
</compile_context>

<pallas_src>
import functools

import jax
import jax.numpy as jnp
from jax import lax
from jax.experimental import pallas as pl
from jax.experimental.pallas import tpu as pltpu


def _round_up(x, m):
    return ((x + m - 1) // m) * m


def rnn_classifier_kernel(ids_ref, ep_ref, whh_ref, wlin_ref, blin_ref,
                          out_ref, *, T):
    """Fused one-hot gather (pre-projected embedding) + RNN recurrence + head.

    ids_ref:  (B, T)   int32 token ids
    ep_ref:   (Vp, H)  = Emb @ W_ih^T (padded vocab rows are zero)
    whh_ref:  (H, H)   = W_hh^T
    wlin_ref: (H, Cp)  = W_lin^T zero-padded to 128 lanes
    blin_ref: (1, Cp)  linear bias zero-padded to 128 lanes
    out_ref:  (B, Cp)  lane-dense logits (wrapper slices to (B, C))
    """
    B = ids_ref.shape[0]
    Vp = ep_ref.shape[0]
    H = whh_ref.shape[0]

    ids = ids_ref[...]                                           # (B, T)
    ep = ep_ref[...]                                             # (Vp, H)
    whh = whh_ref[...]                                           # (H, H)

    # Per-step input projections xw_t = Emb[x[:, t]] @ W_ih^T via an exact
    # one-hot matmul against the pre-projected table.  No dependence on h,
    # so all T of them are off the serial recurrence chain (MXU/VPU filler).
    # NOTE: out-of-range ids (unlike nn.Embedding, which raises) give a zero
    # one-hot row, i.e. a zero embedding.
    lane_iota = lax.broadcasted_iota(jnp.int32, (B, Vp), 1)
    xw = []
    for t in range(T):
        onehot_t = (ids[:, t:t + 1] == lane_iota).astype(jnp.float32)  # (B, Vp)
        xw.append(jnp.dot(onehot_t, ep,
                          preferred_element_type=jnp.float32))         # (B, H)

    # Serial recurrence, fully unrolled; hidden state lives in vregs and only
    # h @ W_hh^T sits on the dependency chain.
    h = jnp.zeros((B, H), jnp.float32)
    for t in range(T):
        h = jnp.tanh(xw[t] + jnp.dot(h, whh,
                                     preferred_element_type=jnp.float32))

    # Classifier head: single lane-dense (B, 128) store.
    out_ref[...] = (jnp.dot(h, wlin_ref[...],
                            preferred_element_type=jnp.float32)
                    + blin_ref[...])


def prepare_params(emb_table, w_ih, w_hh, w_lin, b_lin):
    """One-time static weight prep (call at model init, cache the result)."""
    V, D = emb_table.shape
    H = w_hh.shape[0]
    C = w_lin.shape[0]                       # H + 1
    Vp = _round_up(V, 8)                     # sublane-aligned vocab rows
    Cp = _round_up(C, 128)                   # lane-dense classifier output

    emb_p = jnp.zeros((Vp, D), jnp.float32).at[:V, :].set(emb_table)
    ep = jnp.dot(emb_p, w_ih.T.astype(jnp.float32),
                 preferred_element_type=jnp.float32)             # (Vp, H)
    whh_t = jnp.asarray(w_hh.T, jnp.float32)                     # (H, H)
    wlin_p = jnp.zeros((H, Cp), jnp.float32).at[:, :C].set(w_lin.T)
    blin_p = jnp.zeros((1, Cp), jnp.float32).at[0, :C].set(b_lin)

    params = dict(ep=ep, whh_t=whh_t, wlin_p=wlin_p, blin_p=blin_p)
    return jax.block_until_ready(params), C


@functools.partial(jax.jit, static_argnames=("num_classes",))
def rnn_classifier_forward(token_ids, ep, whh_t, wlin_p, blin_p, *,
                           num_classes):
    """token_ids: (B, T) int32.  Returns logits (B, num_classes) float32."""
    B, T = token_ids.shape
    Cp = wlin_p.shape[1]

    kernel = functools.partial(rnn_classifier_kernel, T=T)

    # Single VMEM-resident block, no grid: every operand is tiny (<1 MiB total)
    # and whole-array blocks sidestep the (8,128) divisibility rule.
    out = pl.pallas_call(
        kernel,
        out_shape=jax.ShapeDtypeStruct((B, Cp), jnp.float32),
        in_specs=[pl.BlockSpec(memory_space=pltpu.MemorySpace.VMEM)] * 5,
        out_specs=pl.BlockSpec(memory_space=pltpu.MemorySpace.VMEM),
    )(token_ids, ep, whh_t, wlin_p, blin_p)

    return out[:, :num_classes]


def reference_forward(token_ids, emb_table, w_ih, w_hh, w_lin, b_lin):
    """Pure-JAX reference matching PyTorch nn.RNN / nn.Linear semantics."""
    x_emb = jnp.take(emb_table, token_ids, axis=0)               # (B, T, D)
    B, T, D = x_emb.shape
    H = w_hh.shape[0]

    def step(h, x_t):
        h_new = jnp.tanh(x_t @ w_ih.T + h @ w_hh.T)
        return h_new, h_new

    h0 = jnp.zeros((B, H), jnp.float32)
    h_last, _ = lax.scan(step, h0, jnp.transpose(x_emb, (1, 0, 2)))
    return h_last @ w_lin.T + b_lin


if __name__ == "__main__":
    # Small shapes consistent with the module: vocab=30, input_size=32,
    # hidden_size=32 -> num classes = hidden_size + 1 = 33; batch=4, seq=8.
    vocab_size, input_size, hidden_size = 30, 32, 32
    B, T = 4, 8

    key = jax.random.PRNGKey(0)
    k_emb, k_ih, k_hh, k_w, k_b, k_x = jax.random.split(key, 6)

    emb_table = 0.1 * jax.random.normal(k_emb, (vocab_size, input_size),
                                        dtype=jnp.float32)
    emb_table = emb_table.at[0].set(0.0)            # padding_idx=0

    w_ih = 0.1 * jax.random.normal(k_ih, (hidden_size, input_size),
                                   dtype=jnp.float32)   # PyTorch weight_ih_l0
    w_hh = 0.1 * jax.random.normal(k_hh, (hidden_size, hidden_size),
                                   dtype=jnp.float32)   # PyTorch weight_hh_l0
    w_lin = 0.1 * jax.random.normal(k_w, (hidden_size + 1, hidden_size),
                                    dtype=jnp.float32)  # nn.Linear weight
    b_lin = 0.1 * jax.random.normal(k_b, (hidden_size + 1,), dtype=jnp.float32)

    token_ids = jax.random.randint(k_x, (B, T), 0, vocab_size, dtype=jnp.int32)

    # Static prep done once (amortized to zero per call).
    params, C = prepare_params(emb_table, w_ih, w_hh, w_lin, b_lin)

    logits = rnn_classifier_forward(token_ids, params["ep"], params["whh_t"],
                                    params["wlin_p"], params["blin_p"],
                                    num_classes=C)
    logits = jax.block_until_ready(logits)

    ref = reference_forward(token_ids, emb_table, w_ih, w_hh, w_lin, b_lin)
    assert logits.shape == (B, C)
    assert jnp.allclose(logits, ref, atol=1e-5, rtol=1e-5)

    # TODO(synk): the training path (nn.CrossEntropyLoss when y is provided)
    # is not implemented; only the inference forward (y_pred) is kernelized.
    print("KERNEL_OK")
</pallas_src>

<mosaic_0001>
module attributes {stable_mosaic.version = 11 : i64} {
  func.func @rnn_classifier_kernel(%arg0: memref<4x8xi32, #tpu.memory_space<vmem>>, %arg1: memref<32x32xf32, #tpu.memory_space<vmem>>, %arg2: memref<32x32xf32, #tpu.memory_space<vmem>>, %arg3: memref<32x128xf32, #tpu.memory_space<vmem>>, %arg4: memref<1x128xf32, #tpu.memory_space<vmem>>, %arg5: memref<4x128xf32, #tpu.memory_space<vmem>>) attributes {dimension_semantics = [], scalar_prefetch = 0 : i64, scratch_operands = 0 : i64, tpu.core_type = #tpu.core_type<tc>} {
    %c0 = arith.constant 0 : index
    %c0_0 = arith.constant 0 : index
    %0 = vector.load %arg0[%c0, %c0_0] : memref<4x8xi32, #tpu.memory_space<vmem>>, vector<4x8xi32>
    %c0_1 = arith.constant 0 : index
    %c0_2 = arith.constant 0 : index
    %1 = vector.load %arg1[%c0_1, %c0_2] : memref<32x32xf32, #tpu.memory_space<vmem>>, vector<32x32xf32>
    %c0_3 = arith.constant 0 : index
    %c0_4 = arith.constant 0 : index
    %2 = vector.load %arg2[%c0_3, %c0_4] : memref<32x32xf32, #tpu.memory_space<vmem>>, vector<32x32xf32>
    %3 = tpu.iota {dimensions = array<i32: 1>} : vector<4x32xi32>
    %4 = vector.extract_strided_slice %0 {offsets = [0, 0], sizes = [4, 1], strides = [1, 1]} : vector<4x8xi32> to vector<4x1xi32>
    %5 = vector.broadcast %4 : vector<4x1xi32> to vector<4x32xi32>
    %6 = arith.cmpi eq, %5, %3 : vector<4x32xi32>
    %7 = arith.extui %6 : vector<4x32xi1> to vector<4x32xi32>
    %8 = arith.sitofp %7 : vector<4x32xi32> to vector<4x32xf32>
    %cst = arith.constant dense<0.000000e+00> : vector<4x32xf32>
    %9 = tpu.matmul %8, %1, %cst {dimension_numbers = #tpu.dot_dimension_numbers<[1], [0], [0], [1], [0, 0, 1, 1], [], []>} : vector<4x32xf32>, vector<32x32xf32>, vector<4x32xf32> -> vector<4x32xf32>
    %10 = vector.extract_strided_slice %0 {offsets = [0, 1], sizes = [4, 1], strides = [1, 1]} : vector<4x8xi32> to vector<4x1xi32>
    %11 = vector.broadcast %10 : vector<4x1xi32> to vector<4x32xi32>
    %12 = arith.cmpi eq, %11, %3 : vector<4x32xi32>
    %13 = arith.extui %12 : vector<4x32xi1> to vector<4x32xi32>
    %14 = arith.sitofp %13 : vector<4x32xi32> to vector<4x32xf32>
    %cst_5 = arith.constant dense<0.000000e+00> : vector<4x32xf32>
    %15 = tpu.matmul %14, %1, %cst_5 {dimension_numbers = #tpu.dot_dimension_numbers<[1], [0], [0], [1], [0, 0, 1, 1], [], []>} : vector<4x32xf32>, vector<32x32xf32>, vector<4x32xf32> -> vector<4x32xf32>
    %16 = vector.extract_strided_slice %0 {offsets = [0, 2], sizes = [4, 1], strides = [1, 1]} : vector<4x8xi32> to vector<4x1xi32>
    %17 = vector.broadcast %16 : vector<4x1xi32> to vector<4x32xi32>
    %18 = arith.cmpi eq, %17, %3 : vector<4x32xi32>
    %19 = arith.extui %18 : vector<4x32xi1> to vector<4x32xi32>
    %20 = arith.sitofp %19 : vector<4x32xi32> to vector<4x32xf32>
    %cst_6 = arith.constant dense<0.000000e+00> : vector<4x32xf32>
    %21 = tpu.matmul %20, %1, %cst_6 {dimension_numbers = #tpu.dot_dimension_numbers<[1], [0], [0], [1], [0, 0, 1, 1], [], []>} : vector<4x32xf32>, vector<32x32xf32>, vector<4x32xf32> -> vector<4x32xf32>
    %22 = vector.extract_strided_slice %0 {offsets = [0, 3], sizes = [4, 1], strides = [1, 1]} : vector<4x8xi32> to vector<4x1xi32>
    %23 = vector.broadcast %22 : vector<4x1xi32> to vector<4x32xi32>
    %24 = arith.cmpi eq, %23, %3 : vector<4x32xi32>
    %25 = arith.extui %24 : vector<4x32xi1> to vector<4x32xi32>
    %26 = arith.sitofp %25 : vector<4x32xi32> to vector<4x32xf32>
    %cst_7 = arith.constant dense<0.000000e+00> : vector<4x32xf32>
    %27 = tpu.matmul %26, %1, %cst_7 {dimension_numbers = #tpu.dot_dimension_numbers<[1], [0], [0], [1], [0, 0, 1, 1], [], []>} : vector<4x32xf32>, vector<32x32xf32>, vector<4x32xf32> -> vector<4x32xf32>
    %28 = vector.extract_strided_slice %0 {offsets = [0, 4], sizes = [4, 1], strides = [1, 1]} : vector<4x8xi32> to vector<4x1xi32>
    %29 = vector.broadcast %28 : vector<4x1xi32> to vector<4x32xi32>
    %30 = arith.cmpi eq, %29, %3 : vector<4x32xi32>
    %31 = arith.extui %30 : vector<4x32xi1> to vector<4x32xi32>
    %32 = arith.sitofp %31 : vector<4x32xi32> to vector<4x32xf32>
    %cst_8 = arith.constant dense<0.000000e+00> : vector<4x32xf32>
    %33 = tpu.matmul %32, %1, %cst_8 {dimension_numbers = #tpu.dot_dimension_numbers<[1], [0], [0], [1], [0, 0, 1, 1], [], []>} : vector<4x32xf32>, vector<32x32xf32>, vector<4x32xf32> -> vector<4x32xf32>
    %34 = vector.extract_strided_slice %0 {offsets = [0, 5], sizes = [4, 1], strides = [1, 1]} : vector<4x8xi32> to vector<4x1xi32>
    %35 = vector.broadcast %34 : vector<4x1xi32> to vector<4x32xi32>
    %36 = arith.cmpi eq, %35, %3 : vector<4x32xi32>
    %37 = arith.extui %36 : vector<4x32xi1> to vector<4x32xi32>
    %38 = arith.sitofp %37 : vector<4x32xi32> to vector<4x32xf32>
    %cst_9 = arith.constant dense<0.000000e+00> : vector<4x32xf32>
    %39 = tpu.matmul %38, %1, %cst_9 {dimension_numbers = #tpu.dot_dimension_numbers<[1], [0], [0], [1], [0, 0, 1, 1], [], []>} : vector<4x32xf32>, vector<32x32xf32>, vector<4x32xf32> -> vector<4x32xf32>
    %40 = vector.extract_strided_slice %0 {offsets = [0, 6], sizes = [4, 1], strides = [1, 1]} : vector<4x8xi32> to vector<4x1xi32>
    %41 = vector.broadcast %40 : vector<4x1xi32> to vector<4x32xi32>
    %42 = arith.cmpi eq, %41, %3 : vector<4x32xi32>
    %43 = arith.extui %42 : vector<4x32xi1> to vector<4x32xi32>
    %44 = arith.sitofp %43 : vector<4x32xi32> to vector<4x32xf32>
    %cst_10 = arith.constant dense<0.000000e+00> : vector<4x32xf32>
    %45 = tpu.matmul %44, %1, %cst_10 {dimension_numbers = #tpu.dot_dimension_numbers<[1], [0], [0], [1], [0, 0, 1, 1], [], []>} : vector<4x32xf32>, vector<32x32xf32>, vector<4x32xf32> -> vector<4x32xf32>
    %46 = vector.extract_strided_slice %0 {offsets = [0, 7], sizes = [4, 1], strides = [1, 1]} : vector<4x8xi32> to vector<4x1xi32>
    %47 = vector.broadcast %46 : vector<4x1xi32> to vector<4x32xi32>
    %48 = arith.cmpi eq, %47, %3 : vector<4x32xi32>
    %49 = arith.extui %48 : vector<4x32xi1> to vector<4x32xi32>
    %50 = arith.sitofp %49 : vector<4x32xi32> to vector<4x32xf32>
    %cst_11 = arith.constant dense<0.000000e+00> : vector<4x32xf32>
    %51 = tpu.matmul %50, %1, %cst_11 {dimension_numbers = #tpu.dot_dimension_numbers<[1], [0], [0], [1], [0, 0, 1, 1], [], []>} : vector<4x32xf32>, vector<32x32xf32>, vector<4x32xf32> -> vector<4x32xf32>
    %cst_12 = arith.constant 0.000000e+00 : f32
    %52 = vector.broadcast %cst_12 : f32 to vector<4x32xf32>
    %cst_13 = arith.constant dense<0.000000e+00> : vector<4x32xf32>
    %53 = tpu.matmul %52, %2, %cst_13 {dimension_numbers = #tpu.dot_dimension_numbers<[1], [0], [0], [1], [0, 0, 1, 1], [], []>} : vector<4x32xf32>, vector<32x32xf32>, vector<4x32xf32> -> vector<4x32xf32>
    %54 = arith.addf %9, %53 : vector<4x32xf32>
    %55 = math.tanh %54 : vector<4x32xf32>
    %cst_14 = arith.constant dense<0.000000e+00> : vector<4x32xf32>
    %56 = tpu.matmul %55, %2, %cst_14 {dimension_numbers = #tpu.dot_dimension_numbers<[1], [0], [0], [1], [0, 0, 1, 1], [], []>} : vector<4x32xf32>, vector<32x32xf32>, vector<4x32xf32> -> vector<4x32xf32>
    %57 = arith.addf %15, %56 : vector<4x32xf32>
    %58 = math.tanh %57 : vector<4x32xf32>
    %cst_15 = arith.constant dense<0.000000e+00> : vector<4x32xf32>
    %59 = tpu.matmul %58, %2, %cst_15 {dimension_numbers = #tpu.dot_dimension_numbers<[1], [0], [0], [1], [0, 0, 1, 1], [], []>} : vector<4x32xf32>, vector<32x32xf32>, vector<4x32xf32> -> vector<4x32xf32>
    %60 = arith.addf %21, %59 : vector<4x32xf32>
    %61 = math.tanh %60 : vector<4x32xf32>
    %cst_16 = arith.constant dense<0.000000e+00> : vector<4x32xf32>
    %62 = tpu.matmul %61, %2, %cst_16 {dimension_numbers = #tpu.dot_dimension_numbers<[1], [0], [0], [1], [0, 0, 1, 1], [], []>} : vector<4x32xf32>, vector<32x32xf32>, vector<4x32xf32> -> vector<4x32xf32>
    %63 = arith.addf %27, %62 : vector<4x32xf32>
    %64 = math.tanh %63 : vector<4x32xf32>
    %cst_17 = arith.constant dense<0.000000e+00> : vector<4x32xf32>
    %65 = tpu.matmul %64, %2, %cst_17 {dimension_numbers = #tpu.dot_dimension_numbers<[1], [0], [0], [1], [0, 0, 1, 1], [], []>} : vector<4x32xf32>, vector<32x32xf32>, vector<4x32xf32> -> vector<4x32xf32>
    %66 = arith.addf %33, %65 : vector<4x32xf32>
    %67 = math.tanh %66 : vector<4x32xf32>
    %cst_18 = arith.constant dense<0.000000e+00> : vector<4x32xf32>
    %68 = tpu.matmul %67, %2, %cst_18 {dimension_numbers = #tpu.dot_dimension_numbers<[1], [0], [0], [1], [0, 0, 1, 1], [], []>} : vector<4x32xf32>, vector<32x32xf32>, vector<4x32xf32> -> vector<4x32xf32>
    %69 = arith.addf %39, %68 : vector<4x32xf32>
    %70 = math.tanh %69 : vector<4x32xf32>
    %cst_19 = arith.constant dense<0.000000e+00> : vector<4x32xf32>
    %71 = tpu.matmul %70, %2, %cst_19 {dimension_numbers = #tpu.dot_dimension_numbers<[1], [0], [0], [1], [0, 0, 1, 1], [], []>} : vector<4x32xf32>, vector<32x32xf32>, vector<4x32xf32> -> vector<4x32xf32>
    %72 = arith.addf %45, %71 : vector<4x32xf32>
    %73 = math.tanh %72 : vector<4x32xf32>
    %cst_20 = arith.constant dense<0.000000e+00> : vector<4x32xf32>
    %74 = tpu.matmul %73, %2, %cst_20 {dimension_numbers = #tpu.dot_dimension_numbers<[1], [0], [0], [1], [0, 0, 1, 1], [], []>} : vector<4x32xf32>, vector<32x32xf32>, vector<4x32xf32> -> vector<4x32xf32>
    %75 = arith.addf %51, %74 : vector<4x32xf32>
    %76 = math.tanh %75 : vector<4x32xf32>
    %c0_21 = arith.constant 0 : index
    %c0_22 = arith.constant 0 : index
    %77 = vector.load %arg3[%c0_21, %c0_22] : memref<32x128xf32, #tpu.memory_space<vmem>>, vector<32x128xf32>
    %cst_23 = arith.constant dense<0.000000e+00> : vector<4x128xf32>
    %78 = tpu.matmul %76, %77, %cst_23 {dimension_numbers = #tpu.dot_dimension_numbers<[1], [0], [0], [1], [0, 0, 1, 1], [], []>} : vector<4x32xf32>, vector<32x128xf32>, vector<4x128xf32> -> vector<4x128xf32>
    %c0_24 = arith.constant 0 : index
    %c0_25 = arith.constant 0 : index
    %79 = vector.load %arg4[%c0_24, %c0_25] : memref<1x128xf32, #tpu.memory_space<vmem>>, vector<1x128xf32>
    %80 = vector.broadcast %79 : vector<1x128xf32> to vector<4x128xf32>
    %81 = arith.addf %78, %80 : vector<4x128xf32>
    %c0_26 = arith.constant 0 : index
    %c0_27 = arith.constant 0 : index
    %82 = vector.load %arg5[%c0_26, %c0_27] : memref<4x128xf32, #tpu.memory_space<vmem>>, vector<4x128xf32>
    tpu.vector_store %arg5[%c0_26, %c0_27], %81 {strides = array<i32>} : memref<4x128xf32, #tpu.memory_space<vmem>>, vector<4x128xf32>,
    return
  }
}

</mosaic_0001>

<bundles_post_ra>
// kernel: rnn_classifier_forward.1
= control target key start
LH: loop header
LB: loop body
LE: loop exit
PB: predicated region body
PF: predicated region fallthrough
CT: control target
= control target key end

     0   :  { %10 = vsyncpa [#allocation3], 0  ;;  %s2261_s0 = inlined_call_operand.hbm [shape: s32[4,8], index: 0, kind: input, shape index: {}]   ;;  %s2262_s1 = inlined_call_operand.hbm [shape: f32[32,32], index: 1, kind: input, shape index: {}]   ;;  %s2263_s2 = inlined_call_operand.hbm [shape: f32[32,32], index: 2, kind: input, shape index: {}]   ;;  %s2264_s3 = inlined_call_operand.hbm [shape: f32[32,128], index: 3, kind: input, shape index: {}]   ;;  %s2265_s4 = inlined_call_operand.vmem [shape: f32[1,128], index: 4, kind: input, shape index: {}]   ;;  %s2266_s5 = inlined_call_operand.hbm [shape: f32[4,128], index: 5, kind: output, shape index: {}]  }
   0x1   :  { %11 = vsyncpa [#allocation6], 0 }
   0x2   :  { %12 = vsyncpa [#allocation9], 0 }
   0x3   :  { %13 = vsyncpa [#allocation4], 0  ;;  %s1988_s18 = smov [#allocation5]   ;;  %s1870_s22 = scalar_lea.hbm %s2262_s1, 512 }
   0x4   :  { %s29_s19 = sshll.u32 %s1988_s18, 4  ;;  %p1871_p0 = scmp.ne.s32.totalorder %s2262_s1, %s1870_s22  ;;  %s30_s19 = int_to_ptr.vmem [resolvable:$true] %s29_s19 }
   0x5   :  { %p1874_p1 = scmp.lt.u32.totalorder %s1870_s22, %s2262_s1 }
   0x7   :  { %p1876_p2 = pnand %p1874_p1, %p1871_p0 }
   0x9   :  { %1879 = shalt.err (!%p1876_p2)
}
   0xa   :  { %s1880_s27 = scalar_lea.vmem %s30_s19, 512  ;;  %p1885_p4 = scmp.lt.s32.totalorder %s30_s19, %s30_s19 }
   0xb   :  { %p1881_p3 = scmp.ne.s32.totalorder %s30_s19, %s1880_s27  ;;  %p1886_p5 = scmp.lt.s32.totalorder %s1880_s27, %s1880_s27 }
   0xd   :  { %p1887_p6 = por %p1886_p5, %p1885_p4 }
   0xf   :  { %p1888_p7 = pnand %p1887_p6, %p1881_p3 }
  0x11   :  { %1891 = shalt.err (!%p1888_p7)
}
  0x12   :  { %s1989_s28 = smov 128   ;;  %s1990_s29 = smov 8  }
  0x13   :  { %35 = dma.hbm_to_vmem [thread:$0]  %s2262_s1, 512, %s30_s19, [#allocation6], %s1989_s28, %s1989_s28, %s1990_s29  }
  0x14   :  { %s1991_s7 = smov [#allocation2]   ;;  %s1992_s9 = smov [#allocation7]  }
  0x15   :  { %s20_s8 = sshll.u32 %s1991_s7, 4  ;;  %s41_s10 = sshll.u32 %s1992_s9, 4  ;;  %s21_s8 = int_to_ptr.vmem [resolvable:$true] %s20_s8  ;;  %s42_s10 = int_to_ptr.vmem [resolvable:$true] %s41_s10 }
  0x16   :  { %s1892_s13 = scalar_lea.hbm %s2261_s0, 64 }
  0x17   :  { %p1893_p8 = scmp.ne.s32.totalorder %s2261_s0, %s1892_s13  ;;  %p1896_p9 = scmp.lt.u32.totalorder %s1892_s13, %s2261_s0 }
  0x19   :  { %p1898_p10 = pnand %p1896_p9, %p1893_p8 }
  0x1b   :  { %1901 = shalt.err (!%p1898_p10)
}
  0x1c   :  { %s1902_s1 = scalar_lea.vmem %s21_s8, 64  ;;  %p1907_p12 = scmp.lt.s32.totalorder %s21_s8, %s21_s8 }
  0x1d   :  { %p1903_p11 = scmp.ne.s32.totalorder %s21_s8, %s1902_s1  ;;  %p1908_p13 = scmp.lt.s32.totalorder %s1902_s1, %s1902_s1 }
  0x1f   :  { %p1909_p0 = por %p1908_p13, %p1907_p12 }
  0x21   :  { %p1910_p1 = pnand %p1909_p0, %p1903_p11 }
  0x23   :  { %1913 = shalt.err (!%p1910_p1)
}
  0x24   :  { %23 = dma.hbm_to_vmem [thread:$0]  %s2261_s0, 64, %s21_s8, [#allocation3]  }
  0x25   :  { %s1914_s22 = scalar_lea.hbm %s2263_s2, 512 }
  0x26   :  { %p1915_p2 = scmp.ne.s32.totalorder %s2263_s2, %s1914_s22  ;;  %p1918_p3 = scmp.lt.u32.totalorder %s1914_s22, %s2263_s2 }
  0x28   :  { %p1920_p4 = pnand %p1918_p3, %p1915_p2 }
  0x2a   :  { %1923 = shalt.err (!%p1920_p4)
}
  0x2b   :  { %s1924_s27 = scalar_lea.vmem %s42_s10, 512  ;;  %p1929_p6 = scmp.lt.s32.totalorder %s42_s10, %s42_s10 }
  0x2c   :  { %p1925_p5 = scmp.ne.s32.totalorder %s42_s10, %s1924_s27  ;;  %p1930_p7 = scmp.lt.s32.totalorder %s1924_s27, %s1924_s27 }
  0x2e   :  { %p1931_p8 = por %p1930_p7, %p1929_p6 }
  0x30   :  { %p1932_p9 = pnand %p1931_p8, %p1925_p5 }
  0x32   :  { %1935 = shalt.err (!%p1932_p9)
}
  0x33   :  { %47 = dma.hbm_to_vmem [thread:$0]  %s2263_s2, 512, %s42_s10, [#allocation6], %s1989_s28, %s1989_s28, %s1990_s29  }
  0x34   :  { %s1993_s6 = smov [#allocation8]   ;;  %s1936_s11 = scalar_lea.hbm %s2264_s3, 512 }
  0x35   :  { %s53_s7 = sshll.u32 %s1993_s6, 4  ;;  %p1937_p10 = scmp.ne.s32.totalorder %s2264_s3, %s1936_s11  ;;  %s54_s7 = int_to_ptr.vmem [resolvable:$true] %s53_s7 }
  0x36   :  { %p1940_p11 = scmp.lt.u32.totalorder %s1936_s11, %s2264_s3 }
  0x38   :  { %p1942_p12 = pnand %p1940_p11, %p1937_p10 }
  0x3a   :  { %1945 = shalt.err (!%p1942_p12)
}
  0x3b   :  { %s1946_s16 = scalar_lea.vmem %s54_s7, 512  ;;  %p1951_p0 = scmp.lt.s32.totalorder %s54_s7, %s54_s7 }
  0x3c   :  { %p1947_p13 = scmp.ne.s32.totalorder %s54_s7, %s1946_s16  ;;  %p1952_p1 = scmp.lt.s32.totalorder %s1946_s16, %s1946_s16 }
  0x3e   :  { %p1953_p2 = por %p1952_p1, %p1951_p0 }
  0x40   :  { %p1954_p3 = pnand %p1953_p2, %p1947_p13 }
  0x42   :  { %1957 = shalt.err (!%p1954_p3)
}
  0x43   :  { %59 = dma.hbm_to_vmem [thread:$0]  %s2264_s3, 512, %s54_s7, [#allocation9], %s1989_s28, %s1989_s28, %s1990_s29  }
  0x44   :  { %1980 = dma.done.wait [#allocation3], 64  }
  0x45   :  { %1981 = vsyncadd [#allocation3], 4294967232 }
  0x46   :  { %1982 = dma.done.wait [#allocation6], 1024  }
  0x47   :  { %1983 = vsyncadd [#allocation6], 4294966272 }
  0x48   :  { %1984 = dma.done.wait [#allocation9], 512  }
  0x49   :  { %1985 = vsyncadd [#allocation9], 4294966784  ;;  %v1994_v0 = vmov 0   ;;  %v1995_v1 = vmov 0.0|0.0   ;;  %vm1996_vm0 = vmmov 0   ;;  %v1997_v2 = vmov 0.0  }
  0x4a   :  { %1845 = vset.pattern.permute.xlu0 %v1994_v0  ;;  %1709 = vmatprep.subr.bf16.mxu0 %v1995_v1  ;;  %v2099_v3 = vld [vmem:[#allocation2] sm:$0xf]  ;;  %v79_v4 = vld [vmem:[#allocation7] sm:$0xff]  ;;  %v80_v5 = vld [vmem:[#allocation7 + $0x8] sm:$0xff]  ;;  %v1998_v12 = vmov 1   ;;  %v83_v17 = vlaneseq  ;;  %vm133_vm1 = vcmask 261120  }
  0x4b   :  { %1530 = vmatprep.mubr.msk.f32.mxu0 %vm1996_vm0, %v1997_v2  ;;  %1721 = vmatprep.subr.bf16.mxu1 %v1995_v1  ;;  %v2102_v6 = vpack.c.bf16 %v80_v5, %v79_v4  ;;  %v81_v7 = vld [vmem:[#allocation7 + $0x10] sm:$0xff]  ;;  %v82_v8 = vld [vmem:[#allocation7 + $0x18] sm:$0xff]  ;;  %v75_v10 = vld [vmem:[#allocation5] sm:$0xff]  ;;  %v1999_v21 = vmov 2   ;;  %v2000_v27 = vmov 3   ;;  %v2001_v33 = vmov 4  }
  0x4c   :  { %1552 = vmatprep.mubr.msk.f32.mxu1 %vm1996_vm0, %v1997_v2  ;;  %86 = vperm.xlu0 %1845, %v2099_v3   ;;  %v2105_v9 = vpack.c.bf16 %v82_v8, %v81_v7  ;;  %v76_v11 = vld [vmem:[#allocation5 + $0x8] sm:$0xff]  ;;  %v77_v14 = vld [vmem:[#allocation5 + $0x10] sm:$0xff]  ;;  %v78_v15 = vld [vmem:[#allocation5 + $0x18] sm:$0xff]  ;;  %v2126_v18 = vand.u32 127, %v83_v17  ;;  %v2002_v39 = vmov 5   ;;  %v2003_v45 = vmov 6  }
  0x4d   :  { %1711 = vmatpush3.bf16.msra.mxu0 %v2102_v6  ;;  %1723 = vmatpush3.bf16.msra.mxu1 %v2102_v6  ;;  %v2112_v13 = vpack.c.bf16 %v76_v11, %v75_v10  ;;  %v2119_v16 = vpack.c.bf16 %v78_v15, %v77_v14  ;;  %v2004_v51 = vmov 7   ;;  %v1310_v62 = vld [vmem:[#allocation8] sm:$0xff]  ;;  %v1311_v63 = vld [vmem:[#allocation8 + $0x8] sm:$0xff]  ;;  %v1312_v0 = vld [vmem:[#allocation8 + $0x10] sm:$0xff]  ;;  %s2005_s29 = smov [#allocation10]  }
  0x4e   :  { %1712 = vmatprep.subr.bf16.mxu0 %v1995_v1  ;;  %1724 = vmatprep.subr.bf16.mxu1 %v1995_v1  ;;  %v1313_v4 = vld [vmem:[#allocation8 + $0x18] sm:$0xff]  ;;  %s1401_s17 = sshll.u32 %s2005_s29, 4  ;;  %s1402_s17 = int_to_ptr.vmem [resolvable:$true] %s1401_s17 }
  0x4f   :  { %1847 = vset.pattern.permute.xlu1 %v1999_v21  ;;  %v1809_v5 = vpack.c.bf16 %v1313_v4, %v1312_v0  ;;  %s1958_s1 = scalar_lea.vmem %s1402_s17, 64  ;;  %p1963_p5 = scmp.lt.s32.totalorder %s1402_s17, %s1402_s17 }
  0x50   :  { %1846 = vset.pattern.permute.xlu0 %v1998_v12  ;;  %98 = vperm.xlu1 %1847, %v2099_v3   ;;  %p1959_p4 = scmp.ne.s32.totalorder %s1402_s17, %s1958_s1  ;;  %p1964_p6 = scmp.lt.s32.totalorder %s1958_s1, %s1958_s1 }
  0x51   :  { %92 = vperm.xlu0 %1846, %v2099_v3   ;;  %1714 = vmatpush3.bf16.msra.mxu0 %v2105_v9 }
  0x52   :  { %1726 = vmatpush3.bf16.msra.mxu1 %v2105_v9  ;;  %1715 = vmatprep.subr.bf16.mxu0 %v1995_v1  ;;  %p1965_p7 = por %p1964_p6, %p1963_p5 }
  0x53   :  { %1727 = vmatprep.subr.bf16.mxu1 %v1995_v1 }
  0x54   :  { %1531 = vmatmul.mubr.f32.vlgmr.msra.gmra.mrb[0].mxu0 %v1997_v2  ;;  %1848 = vset.pattern.permute.xlu1 %v2000_v27  ;;  %p1966_p8 = pnand %p1965_p7, %p1959_p4 }
  0x55   :  { %1717 = vmatpush3.bf16.msra.mxu0 %v2112_v13  ;;  %1541 = vmatprep.mubr.msk.f32.mxu0 %vm1996_vm0, %v1997_v2 }
  0x56   :  { %1718 = vmatprep.subr.bf16.mxu0 %v1995_v1  ;;  %104 = vperm.xlu1 %1848, %v2099_v3  }
  0x57   :  { %1850 = vset.pattern.permute.xlu0 %v2002_v39 }
  0x58   :  { %116 = vperm.xlu0 %1850, %v2099_v3  }
  0x59   :  { %1720 = vmatpush3.bf16.msra.mxu0 %v2119_v16 }
  0x5a   :  { %1733 = vmatprep.subr.bf16.mxu0 %v1995_v1  ;;  %1849 = vset.pattern.permute.xlu1 %v2001_v33 }
  0x5b   :  { %110 = vperm.xlu1 %1849, %v2099_v3  }
  0x5c   :  { %1853 = vset.pattern.permute.xlu0 %v2004_v51 }
  0x5f   :  { %1851 = vset.pattern.permute.xlu1 %v2003_v45 }
  0x60   :  { %122 = vperm.xlu1 %1851, %v2099_v3  }
  0x64   :  { %1852 = vset.pattern.permute.xlu1 %v2004_v51 }
  0x65   :  { %128 = vperm.xlu1 %1852, %v2099_v3   ;;  %v1806_v3 = vpack.c.bf16 %v1311_v63, %v1310_v62 }
  0xcb   :  { %v87_v19 = vpop.permute.xlu0 %86 }
  0xcc   :  { %vm88_vm2 = vcmp.eq.s32.totalorder %v87_v19, %v2126_v18 }
  0xcd   :  { %v1412_v20 = vsel %vm88_vm2, 1.0, %v1997_v2 }
  0xce   :  { %1542 = vmatmul.mubr.msk.f32.vlgmr.msra.gmra.mrb[0].mxu0 %vm133_vm1, %v1412_v20 }
  0xcf   :  { %1735 = vmatpush3.bf16.msra.mxu0 %v2102_v6  ;;  %1574 = vmatprep.mubr.msk.f32.mxu0 %vm1996_vm0, %v1997_v2  ;;  %v99_v31 = vpop.permute.xlu1 %98 }
  0xd0   :  { %1736 = vmatprep.subr.bf16.mxu0 %v1995_v1  ;;  %v93_v25 = vpop.permute.xlu0 %92  ;;  %vm100_vm4 = vcmp.eq.s32.totalorder %v99_v31, %v2126_v18 }
  0xd1   :  { %vm94_vm3 = vcmp.eq.s32.totalorder %v93_v25, %v2126_v18  ;;  %v1414_v32 = vsel %vm100_vm4, 1.0, %v1997_v2 }
  0xd2   :  { %v1413_v26 = vsel %vm94_vm3, 1.0, %v1997_v2 }
  0xd3   :  { %1738 = vmatpush3.bf16.msra.mxu0 %v2105_v9 }
  0xd4   :  { %1739 = vmatprep.subr.bf16.mxu0 %v1995_v1 }
  0xd5   :  { %v105_v37 = vpop.permute.xlu1 %104 }
  0xd6   :  { %vm106_vm5 = vcmp.eq.s32.totalorder %v105_v37, %v2126_v18 }
  0xd7   :  { %v1415_v38 = vsel %vm106_vm5, 1.0, %v1997_v2  ;;  %v117_v49 = vpop.permute.xlu0 %116 }
  0xd8   :  { %vm118_vm7 = vcmp.eq.s32.totalorder %v117_v49, %v2126_v18 }
  0xd9   :  { %v1417_v50 = vsel %vm118_vm7, 1.0, %v1997_v2 }
  0xda   :  { %v111_v43 = vpop.permute.xlu1 %110 }
  0xdb   :  { %vm112_vm6 = vcmp.eq.s32.totalorder %v111_v43, %v2126_v18 }
  0xdc   :  { %v1416_v44 = vsel %vm112_vm6, 1.0, %v1997_v2 }
  0xdf   :  { %v123_v55 = vpop.permute.xlu1 %122 }
  0xe0   :  { %vm124_vm8 = vcmp.eq.s32.totalorder %v123_v55, %v2126_v18 }
  0xe1   :  { %v1418_v56 = vsel %vm124_vm8, 1.0, %v1997_v2 }
  0xe4   :  { %v129_v60 = vpop.permute.xlu1 %128 }
  0xe5   :  { %vm130_vm9 = vcmp.eq.s32.totalorder %v129_v60, %v2126_v18 }
  0xe6   :  { %v1419_v61 = vsel %vm130_vm9, 1.0, %v1997_v2 }
 0x1a1   :  { %v276_v22 = vpop.f32.mrb[0].mxu0 }
 0x1a2   :  { %1854 = vtanh.f32 %v276_v22  ;;  %v1543_v23 = vpop.f32.mrb[1].mxu0 }
 0x1ac   :  { %v1855_v24 = vpop.eup %1854 }
 0x1ad   :  { %1553 = vmatmul.mubr.msk.f32.vlgmr.msra.gmra.mrb[0].mxu1 %vm133_vm1, %v1855_v24 }
 0x1ae   :  { %1729 = vmatpush3.bf16.msra.mxu1 %v2112_v13  ;;  %1563 = vmatprep.mubr.msk.f32.mxu1 %vm1996_vm0, %v1997_v2 }
 0x1af   :  { %1730 = vmatprep.subr.bf16.mxu1 %v1995_v1 }
 0x1b2   :  { %1732 = vmatpush3.bf16.msra.mxu1 %v2119_v16 }
 0x1b3   :  { %1745 = vmatprep.subr.bf16.mxu1 %v1995_v1 }
 0x1b5   :  { %1564 = vmatmul.mubr.msk.f32.vlgmr.msra.gmra.mrb[0].mxu1 %vm133_vm1, %v1413_v26 }
 0x1b6   :  { %1747 = vmatpush3.bf16.msra.mxu1 %v2102_v6  ;;  %1596 = vmatprep.mubr.msk.f32.mxu1 %vm1996_vm0, %v1997_v2 }
 0x1b7   :  { %1748 = vmatprep.subr.bf16.mxu1 %v1995_v1 }
 0x1ba   :  { %1750 = vmatpush3.bf16.msra.mxu1 %v2105_v9 }
 0x1bb   :  { %1751 = vmatprep.subr.bf16.mxu1 %v1995_v1 }
 0x288   :  { %v423_v28 = vpop.f32.mrb[0].mxu1 }
 0x289   :  { %1856 = vtanh.f32 %v423_v28  ;;  %v1565_v29 = vpop.f32.mrb[1].mxu1 }
 0x293   :  { %v1857_v30 = vpop.eup %1856 }
 0x294   :  { %1575 = vmatmul.mubr.msk.f32.vlgmr.msra.gmra.mrb[2].mxu0 %vm133_vm1, %v1857_v30 }
 0x295   :  { %1741 = vmatpush3.bf16.msra.mxu0 %v2112_v13  ;;  %1585 = vmatprep.mubr.msk.f32.mxu0 %vm1996_vm0, %v1997_v2 }
 0x296   :  { %1742 = vmatprep.subr.bf16.mxu0 %v1995_v1 }
 0x299   :  { %1744 = vmatpush3.bf16.msra.mxu0 %v2119_v16 }
 0x29a   :  { %1757 = vmatprep.subr.bf16.mxu0 %v1995_v1 }
 0x29c   :  { %1586 = vmatmul.mubr.msk.f32.vlgmr.msra.gmra.mrb[2].mxu0 %vm133_vm1, %v1414_v32 }
 0x29d   :  { %1759 = vmatpush3.bf16.msra.mxu0 %v2102_v6  ;;  %1618 = vmatprep.mubr.msk.f32.mxu0 %vm1996_vm0, %v1997_v2 }
 0x29e   :  { %1760 = vmatprep.subr.bf16.mxu0 %v1995_v1 }
 0x2a1   :  { %1762 = vmatpush3.bf16.msra.mxu0 %v2105_v9 }
 0x2a2   :  { %1763 = vmatprep.subr.bf16.mxu0 %v1995_v1 }
 0x36f   :  { %v570_v34 = vpop.f32.mrb[2].mxu0 }
 0x370   :  { %1858 = vtanh.f32 %v570_v34  ;;  %v1587_v35 = vpop.f32.mrb[3].mxu0 }
 0x37a   :  { %v1859_v36 = vpop.eup %1858 }
 0x37b   :  { %1597 = vmatmul.mubr.msk.f32.vlgmr.msra.gmra.mrb[2].mxu1 %vm133_vm1, %v1859_v36 }
 0x37c   :  { %1753 = vmatpush3.bf16.msra.mxu1 %v2112_v13  ;;  %1607 = vmatprep.mubr.msk.f32.mxu1 %vm1996_vm0, %v1997_v2 }
 0x37d   :  { %1754 = vmatprep.subr.bf16.mxu1 %v1995_v1 }
 0x380   :  { %1756 = vmatpush3.bf16.msra.mxu1 %v2119_v16 }
 0x381   :  { %1769 = vmatprep.subr.bf16.mxu1 %v1995_v1 }
 0x383   :  { %1608 = vmatmul.mubr.msk.f32.vlgmr.msra.gmra.mrb[2].mxu1 %vm133_vm1, %v1415_v38 }
 0x384   :  { %1771 = vmatpush3.bf16.msra.mxu1 %v2102_v6  ;;  %1640 = vmatprep.mubr.msk.f32.mxu1 %vm1996_vm0, %v1997_v2 }
 0x385   :  { %1772 = vmatprep.subr.bf16.mxu1 %v1995_v1 }
 0x388   :  { %1774 = vmatpush3.bf16.msra.mxu1 %v2105_v9 }
 0x389   :  { %1775 = vmatprep.subr.bf16.mxu1 %v1995_v1 }
 0x456   :  { %v717_v40 = vpop.f32.mrb[2].mxu1 }
 0x457   :  { %1860 = vtanh.f32 %v717_v40  ;;  %v1609_v41 = vpop.f32.mrb[3].mxu1 }
 0x461   :  { %v1861_v42 = vpop.eup %1860 }
 0x462   :  { %1619 = vmatmul.mubr.msk.f32.vlgmr.msra.gmra.mrb[4].mxu0 %vm133_vm1, %v1861_v42 }
 0x463   :  { %1765 = vmatpush3.bf16.msra.mxu0 %v2112_v13  ;;  %1629 = vmatprep.mubr.msk.f32.mxu0 %vm1996_vm0, %v1997_v2 }
 0x464   :  { %1766 = vmatprep.subr.bf16.mxu0 %v1995_v1 }
 0x467   :  { %1768 = vmatpush3.bf16.msra.mxu0 %v2119_v16 }
 0x468   :  { %1781 = vmatprep.subr.bf16.mxu0 %v1995_v1 }
 0x46a   :  { %1630 = vmatmul.mubr.msk.f32.vlgmr.msra.gmra.mrb[4].mxu0 %vm133_vm1, %v1416_v44 }
 0x46b   :  { %1783 = vmatpush3.bf16.msra.mxu0 %v2102_v6  ;;  %1662 = vmatprep.mubr.msk.f32.mxu0 %vm1996_vm0, %v1997_v2 }
 0x46c   :  { %1784 = vmatprep.subr.bf16.mxu0 %v1995_v1 }
 0x46f   :  { %1786 = vmatpush3.bf16.msra.mxu0 %v2105_v9 }
 0x470   :  { %1787 = vmatprep.subr.bf16.mxu0 %v1995_v1 }
 0x53d   :  { %v864_v46 = vpop.f32.mrb[4].mxu0 }
 0x53e   :  { %1862 = vtanh.f32 %v864_v46  ;;  %v1631_v47 = vpop.f32.mrb[5].mxu0 }
 0x548   :  { %v1863_v48 = vpop.eup %1862 }
 0x549   :  { %1641 = vmatmul.mubr.msk.f32.vlgmr.msra.gmra.mrb[4].mxu1 %vm133_vm1, %v1863_v48 }
 0x54a   :  { %1777 = vmatpush3.bf16.msra.mxu1 %v2112_v13  ;;  %1651 = vmatprep.mubr.msk.f32.mxu1 %vm1996_vm0, %v1997_v2 }
 0x54b   :  { %1778 = vmatprep.subr.bf16.mxu1 %v1995_v1 }
 0x54e   :  { %1780 = vmatpush3.bf16.msra.mxu1 %v2119_v16 }
 0x54f   :  { %1793 = vmatprep.subr.bf16.mxu1 %v1995_v1 }
 0x551   :  { %1652 = vmatmul.mubr.msk.f32.vlgmr.msra.gmra.mrb[4].mxu1 %vm133_vm1, %v1417_v50 }
 0x552   :  { %1795 = vmatpush3.bf16.msra.mxu1 %v2102_v6  ;;  %1684 = vmatprep.mubr.msk.f32.mxu1 %vm1996_vm0, %v1997_v2 }
 0x553   :  { %1796 = vmatprep.subr.bf16.mxu1 %v1995_v1 }
 0x556   :  { %1798 = vmatpush3.bf16.msra.mxu1 %v2105_v9 }
 0x557   :  { %1799 = vmatprep.subr.bf16.mxu1 %v1995_v1 }
 0x624   :  { %v1011_v52 = vpop.f32.mrb[4].mxu1 }
 0x625   :  { %1864 = vtanh.f32 %v1011_v52  ;;  %v1653_v53 = vpop.f32.mrb[5].mxu1 }
 0x62f   :  { %v1865_v54 = vpop.eup %1864 }
 0x630   :  { %1663 = vmatmul.mubr.msk.f32.vlgmr.msra.gmra.mrb[6].mxu0 %vm133_vm1, %v1865_v54 }
 0x631   :  { %1789 = vmatpush3.bf16.msra.mxu0 %v2112_v13  ;;  %1673 = vmatprep.mubr.msk.f32.mxu0 %vm1996_vm0, %v1997_v2 }
 0x632   :  { %1790 = vmatprep.subr.bf16.mxu0 %v1995_v1 }
 0x635   :  { %1792 = vmatpush3.bf16.msra.mxu0 %v2119_v16 }
 0x636   :  { %1805 = vmatprep.subr.bf16.mxu0 %v1995_v1 }
 0x638   :  { %1674 = vmatmul.mubr.msk.f32.vlgmr.msra.gmra.mrb[6].mxu0 %vm133_vm1, %v1418_v56 }
 0x639   :  { %1706 = vmatprep.mubr.msk.f32.mxu0 %vm1996_vm0, %v1997_v2  ;;  %1807 = vmatpush3.bf16.msra.mxu0 %v1806_v3 }
 0x63a   :  { %1808 = vmatprep.subr.bf16.mxu0 %v1995_v1 }
 0x63d   :  { %1810 = vmatpush3.bf16.msra.mxu0 %v1809_v5 }
 0x70b   :  { %v1158_v57 = vpop.f32.mrb[6].mxu0 }
 0x70c   :  { %1866 = vtanh.f32 %v1158_v57  ;;  %v1675_v58 = vpop.f32.mrb[7].mxu0 }
 0x716   :  { %v1867_v59 = vpop.eup %1866 }
 0x717   :  { %1685 = vmatmul.mubr.msk.f32.vlgmr.msra.gmra.mrb[6].mxu1 %vm133_vm1, %v1867_v59 }
 0x718   :  { %1801 = vmatpush3.bf16.msra.mxu1 %v2112_v13  ;;  %1695 = vmatprep.mubr.msk.f32.mxu1 %vm1996_vm0, %v1997_v2  ;;  %v1435_v2 = vld [vmem:[%s2265_s4] ss:$0 sm:$0xff] }
 0x719   :  { %1802 = vmatprep.subr.bf16.mxu1 %v1995_v1 }
 0x71c   :  { %1804 = vmatpush3.bf16.msra.mxu1 %v2119_v16 }
 0x71f   :  { %1696 = vmatmul.mubr.msk.f32.vlgmr.msra.gmra.mrb[6].mxu1 %vm133_vm1, %v1419_v61 }
 0x7f2   :  { %v1305_v6 = vpop.f32.mrb[6].mxu1 }
 0x7f3   :  { %1868 = vtanh.f32 %v1305_v6  ;;  %v1697_v7 = vpop.f32.mrb[7].mxu1 }
 0x7fd   :  { %v1869_v8 = vpop.eup %1868 }
 0x7fe   :  { %1707 = vmatmul.mubr.msk.f32.vlgmr.msra.gmra.mrb[8].mxu0 %vm133_vm1, %v1869_v8 }
 0x8d1   :  { %v1390_v9 = vpop.f32.mrb[8].mxu0 }
 0x8d2   :  { %v1391_v10 = vadd.f32 %v1435_v2, %v1390_v9  ;;  %v1708_v11 = vpop.f32.mrb[9].mxu0 }
 0x8d4   :  { %1394 = vst [vmem:[#allocation10] sm:$0xf] %v1391_v10 }
 0x8d5   :  { %1969 = shalt.err (!%p1966_p8)
}
 0x8d6   :  { %s1970_s20 = scalar_lea.hbm %s2266_s5, 64 }
 0x8d7   :  { %p1971_p9 = scmp.ne.s32.totalorder %s2266_s5, %s1970_s20  ;;  %p1974_p10 = scmp.lt.u32.totalorder %s1970_s20, %s2266_s5 }
 0x8d9   :  { %p1976_p11 = pnand %p1974_p10, %p1971_p9 }
 0x8db   :  { %1979 = shalt.err (!%p1976_p11)
}
 0x8dc   :  { %1404 = dma.vmem_to_hbm [thread:$0]  %s1402_s17, 64, %s2266_s5, [#allocation4]  }
 0x8dd   :  { %1986 = dma.done.wait [#allocation4], 64  }
 0x8de   :  { %1987 = vsyncadd [#allocation4], 4294967232 }
 0x8df   :  { %1408 = vsyncpa [#allocation3], 1 }
 0x8e0   :  { %1409 = vsyncpa [#allocation6], 1 }
 0x8e1   :  { %1410 = vsyncpa [#allocation9], 1 }
 0x8e2   :  { %1411 = vsyncpa [#allocation4], 1 }

</bundles_post_ra>
